<compile_context>
chip_gen: v6e
topology: v6e:2x2x1
jax: 0.10.0
libtpu: 0.0.40
codegen_flags: <defaults>
</compile_context>

<pallas_src>
import jax
import jax.numpy as jnp
from jax.experimental import pallas as pl
from jax.experimental.pallas import tpu as pltpu


def cfg_denoiser_kernel(cs_ref, sigma_ref, x_ref, h_ref, w_ref, o_ref):
    # cs_ref   : (1,)        f32   SMEM (scalar-prefetched cond_scale)
    # sigma_ref: (B,)        f32   SMEM (scalar-prefetched, shared by both CFG branches)
    # x_ref    : (B, dT)     bf16  VMEM (single copy: c_skip*x cancels in (c - u))
    # h_ref    : (2B, E+1)   bf16  VMEM (mean_seq([uncond; cond]) + ones column, resident)
    # w_ref    : (E+1, dT)   bf16  VMEM (bias folded in as the last row)
    # o_ref    : (B, dT)     bf16  VMEM
    B = o_ref.shape[0]

    # Native bf16 x bf16 -> f32 MXU matmul; both CFG branches + bias in one push.
    proj = jnp.dot(h_ref[...], w_ref[...],
                   preferred_element_type=jnp.float32)       # (2B, dT) f32
    eps = jnp.tanh(proj)                                      # EUP
    eps_u = eps[:B, :]
    eps_c = eps[B:, :]
    cs = cs_ref[0]
    eps_cfg = eps_u + (eps_c - eps_u) * cs                    # (B, dT) f32

    x = x_ref[...].astype(jnp.float32)                        # (B, dT)

    # Per-row k-diffusion preconditioning from SMEM scalars; the x*c_skip term
    # is identical in both CFG halves and passes straight through.
    rows = []
    for i in range(B):                                        # B is small & static
        sig = sigma_ref[i]
        sig2 = sig * sig
        c_skip = 1.0 / (sig2 + 1.0)
        c_out = sig * jax.lax.rsqrt(sig2 + 1.0)
        rows.append(x[i:i + 1, :] * c_skip + eps_cfg[i:i + 1, :] * c_out)
    o_ref[...] = jnp.concatenate(rows, axis=0).astype(o_ref.dtype)


def prepare_inner_model_params(w_p, b_p):
    """One-time parameter prep (hoisted out of the per-call hot path):
    fold the bias in as an extra row of W, pad the lane dim to a multiple of
    512, and cast to bf16.  Padded columns are exactly zero (incl. bias row)."""
    E, D = w_p.shape
    d512 = ((D + 511) // 512) * 512
    w_aug = jnp.concatenate(
        [jnp.asarray(w_p, jnp.float32),
         jnp.asarray(b_p, jnp.float32).reshape(1, D)], axis=0)         # (E+1, D)
    if d512 != D:
        w_aug = jnp.pad(w_aug, ((0, 0), (0, d512 - D)))
    return w_aug.astype(jnp.bfloat16)                                   # (E+1, D_pad)


def _vmem_budget():
    """Generation-aware VMEM budgets (v7x only has 64 MiB physical VMEM)."""
    cap = 128 * 1024 * 1024
    try:
        info = pltpu.get_tpu_info()
        cap = int(getattr(info, "vmem_capacity_bytes", cap))
    except Exception:
        pass
    step_budget = min(cap // 4, 24 * 1024 * 1024)   # per-step working set
    vmem_limit = min(cap // 2, 64 * 1024 * 1024)    # scoped limit passed to Mosaic
    return step_budget, vmem_limit


def _choose_lane_tile(D_pad, E1, B, budget_bytes):
    """Largest multiple-of-512 divisor of D_pad whose per-step working set
    (double-buffered DMA blocks + f32 intermediates) fits the budget.
    D_pad is already 512-aligned, so the result always divides it exactly and
    collapses to a single grid step whenever possible (grid is a serial loop;
    fewer, bigger steps win)."""
    def step_bytes(dT):
        dma = 2 * (E1 * dT * 2 + B * dT * 2 + B * dT * 2)   # W, x, out (bf16, double-buffered)
        f32_tmp = 6 * B * dT * 4                            # proj+eps (2B each), eps_cfg, x upcast
        return dma + f32_tmp

    if step_bytes(D_pad) <= budget_bytes:
        return D_pad
    n = D_pad // 512
    best = 512
    for k in range(1, n + 1):
        if n % k == 0 and step_bytes(k * 512) <= budget_bytes:
            best = k * 512
    return best


def cfg_denoiser(x, sigma, uncond, cond, cond_scale, w_aug):
    """x: [B,C,H,W] bf16, sigma: [B] f32, uncond/cond: [B,S,E] bf16,
    w_aug: prepared (E+1, D_pad) bf16 weights from prepare_inner_model_params."""
    B, C, H, Wd = x.shape
    D = C * H * Wd
    E1, D_pad = w_aug.shape                                  # E+1, 512-aligned D

    # Hoisted inner-model prefix: sequence-mean of the tiny conditioning
    # streams + constant-1 column picking up the folded bias row.
    h = jnp.concatenate(
        [jnp.mean(uncond.astype(jnp.float32), axis=1),
         jnp.mean(cond.astype(jnp.float32), axis=1)], axis=0)            # (2B, E)
    h = jnp.concatenate([h, jnp.ones((2 * B, 1), jnp.float32)], axis=1)  # (2B, E+1)
    h = h.astype(jnp.bfloat16)

    x_flat = x.reshape(B, D)
    if D_pad != D:
        x_flat = jnp.pad(x_flat, ((0, 0), (0, D_pad - D)))

    cs = jnp.asarray([cond_scale], dtype=jnp.float32)
    sig = sigma.astype(jnp.float32).reshape(B)

    step_budget, vmem_limit = _vmem_budget()
    dT = _choose_lane_tile(D_pad, E1, B, step_budget)
    grid = (D_pad // dT,)

    out_flat = pl.pallas_call(
        cfg_denoiser_kernel,
        out_shape=jax.ShapeDtypeStruct((B, D_pad), x.dtype),
        grid_spec=pltpu.PrefetchScalarGridSpec(
            num_scalar_prefetch=2,
            grid=grid,
            in_specs=[
                pl.BlockSpec((B, dT), lambda j, cs_r, sg_r: (0, j)),       # x (single copy)
                pl.BlockSpec((2 * B, E1), lambda j, cs_r, sg_r: (0, 0)),   # h (tiny, resident)
                pl.BlockSpec((E1, dT), lambda j, cs_r, sg_r: (0, j)),      # W (+bias row)
            ],
            out_specs=pl.BlockSpec((B, dT), lambda j, cs_r, sg_r: (0, j)),
        ),
        compiler_params=pltpu.CompilerParams(
            dimension_semantics=("parallel",),
            vmem_limit_bytes=vmem_limit),
    )(cs, sig, x_flat, h, w_aug)

    if D_pad != D:
        out_flat = out_flat[:, :D]
    return out_flat.reshape(B, C, H, Wd)


def cfg_denoiser_ref(x, sigma, uncond, cond, cond_scale, params):
    """Pure-JAX reference matching the PyTorch forward semantics (cat/chunk).
    Uses the same bf16 storage for W / bias / h as the kernel (f32 compute)."""
    w_p, b_p = params
    B = x.shape[0]
    w = jnp.asarray(w_p, jnp.float32).astype(jnp.bfloat16).astype(jnp.float32)
    b = jnp.asarray(b_p, jnp.float32).astype(jnp.bfloat16).astype(jnp.float32).reshape(1, -1)
    x_in = jnp.concatenate([x] * 2, axis=0).astype(jnp.float32).reshape(2 * B, -1)
    sigma_in = jnp.concatenate([sigma] * 2, axis=0).astype(jnp.float32)[:, None]
    cond_in = jnp.concatenate([uncond, cond], axis=0).astype(jnp.float32)
    h = jnp.mean(cond_in, axis=1).astype(jnp.bfloat16).astype(jnp.float32)
    proj = h @ w + b
    sig2 = sigma_in * sigma_in
    denoised = x_in * (1.0 / (sig2 + 1.0)) + jnp.tanh(proj) * (sigma_in * jax.lax.rsqrt(sig2 + 1.0))
    u, c = denoised[:B], denoised[B:]
    out = u + (c - u) * cond_scale
    return out.reshape(x.shape).astype(x.dtype)


if __name__ == "__main__":
    B, C, H, W = 2, 4, 16, 16
    S, E = 8, 32
    D = C * H * W

    key = jax.random.PRNGKey(0)
    kx, ks, ku, kc, kw, kb = jax.random.split(key, 6)

    x = jax.random.normal(kx, (B, C, H, W), dtype=jnp.float32).astype(jnp.bfloat16)
    sigma = jax.random.uniform(ks, (B,), dtype=jnp.float32, minval=0.5, maxval=5.0)
    uncond = jax.random.normal(ku, (B, S, E), dtype=jnp.float32).astype(jnp.bfloat16)
    cond = jax.random.normal(kc, (B, S, E), dtype=jnp.float32).astype(jnp.bfloat16)
    cond_scale = 7.5

    # Deterministic synthetic inner-model parameters.
    w_p = jax.random.normal(kw, (E, D), dtype=jnp.float32) * 0.1
    b_p = jax.random.normal(kb, (1, D), dtype=jnp.float32) * 0.05

    # One-time parameter preparation (hoisted out of the per-call path).
    w_aug = prepare_inner_model_params(w_p, b_p)

    out = cfg_denoiser(x, sigma, uncond, cond, cond_scale, w_aug)
    out = jax.block_until_ready(out)

    ref = cfg_denoiser_ref(x, sigma, uncond, cond, cond_scale, (w_p, b_p))
    assert out.shape == (B, C, H, W) and out.dtype == jnp.bfloat16
    assert jnp.allclose(out.astype(jnp.float32), ref.astype(jnp.float32),
                        atol=1e-1, rtol=3e-2), "mismatch vs reference"

    print("KERNEL_OK")
</pallas_src>

<mosaic_0001>
module attributes {stable_mosaic.version = 11 : i64} {
  func.func @cfg_denoiser_kernel(%arg0: i32, %arg1: memref<1xf32, #tpu.memory_space<smem>>, %arg2: memref<2xf32, #tpu.memory_space<smem>>, %arg3: memref<2x1024xbf16, #tpu.memory_space<vmem>>, %arg4: memref<4x33xbf16, #tpu.memory_space<vmem>>, %arg5: memref<33x1024xbf16, #tpu.memory_space<vmem>>, %arg6: memref<2x1024xbf16, #tpu.memory_space<vmem>>) attributes {dimension_semantics = [#tpu.dimension_semantics<parallel>], iteration_bounds = array<i64: 1>, scalar_prefetch = 2 : i64, scratch_operands = 0 : i64, tpu.core_type = #tpu.core_type<tc>, window_params = [{transform_indices = @transform_0, window_bounds = array<i64: 2, 1024>}, {pipeline_mode = #tpu.pipeline_mode<synchronous>, transform_indices = @transform_1, window_bounds = array<i64: 4, 33>}, {transform_indices = @transform_2, window_bounds = array<i64: 33, 1024>}, {transform_indices = @transform_3, window_bounds = array<i64: 2, 1024>}]} {
    %c0 = arith.constant 0 : index
    %c0_0 = arith.constant 0 : index
    %0 = vector.load %arg4[%c0, %c0_0] : memref<4x33xbf16, #tpu.memory_space<vmem>>, vector<4x33xbf16>
    %c0_1 = arith.constant 0 : index
    %c0_2 = arith.constant 0 : index
    %1 = vector.load %arg5[%c0_1, %c0_2] : memref<33x1024xbf16, #tpu.memory_space<vmem>>, vector<33x1024xbf16>
    %cst = arith.constant dense<0.000000e+00> : vector<4x1024xf32>
    %2 = tpu.matmul %0, %1, %cst {dimension_numbers = #tpu.dot_dimension_numbers<[1], [0], [0], [1], [0, 0, 1, 1], [], []>} : vector<4x33xbf16>, vector<33x1024xbf16>, vector<4x1024xf32> -> vector<4x1024xf32>
    %3 = math.tanh %2 : vector<4x1024xf32>
    %4 = vector.extract_strided_slice %3 {offsets = [0, 0], sizes = [2, 1024], strides = [1, 1]} : vector<4x1024xf32> to vector<2x1024xf32>
    %5 = vector.extract_strided_slice %3 {offsets = [2, 0], sizes = [2, 1024], strides = [1, 1]} : vector<4x1024xf32> to vector<2x1024xf32>
    %c0_3 = arith.constant 0 : index
    %6 = memref.load %arg1[%c0_3] : memref<1xf32, #tpu.memory_space<smem>>
    %7 = arith.subf %5, %4 : vector<2x1024xf32>
    %8 = vector.broadcast %6 : f32 to vector<2x1024xf32>
    %9 = arith.mulf %7, %8 : vector<2x1024xf32>
    %10 = arith.addf %4, %9 : vector<2x1024xf32>
    %c0_4 = arith.constant 0 : index
    %c0_5 = arith.constant 0 : index
    %11 = vector.load %arg3[%c0_4, %c0_5] : memref<2x1024xbf16, #tpu.memory_space<vmem>>, vector<2x1024xbf16>
    %12 = arith.extf %11 : vector<2x1024xbf16> to vector<2x1024xf32>
    %c0_6 = arith.constant 0 : index
    %13 = memref.load %arg2[%c0_6] : memref<2xf32, #tpu.memory_space<smem>>
    %14 = arith.mulf %13, %13 : f32
    %cst_7 = arith.constant 1.000000e+00 : f32
    %15 = arith.addf %14, %cst_7 : f32
    %cst_8 = arith.constant 1.000000e+00 : f32
    %16 = arith.divf %cst_8, %15 : f32
    %cst_9 = arith.constant 1.000000e+00 : f32
    %17 = arith.addf %14, %cst_9 : f32
    %18 = math.rsqrt %17 : f32
    %19 = arith.mulf %13, %18 : f32
    %20 = vector.extract_strided_slice %12 {offsets = [0, 0], sizes = [1, 1024], strides = [1, 1]} : vector<2x1024xf32> to vector<1x1024xf32>
    %21 = vector.broadcast %16 : f32 to vector<1x1024xf32>
    %22 = arith.mulf %20, %21 : vector<1x1024xf32>
    %23 = vector.extract_strided_slice %10 {offsets = [0, 0], sizes = [1, 1024], strides = [1, 1]} : vector<2x1024xf32> to vector<1x1024xf32>
    %24 = vector.broadcast %19 : f32 to vector<1x1024xf32>
    %25 = arith.mulf %23, %24 : vector<1x1024xf32>
    %26 = arith.addf %22, %25 : vector<1x1024xf32>
    %c1 = arith.constant 1 : index
    %27 = memref.load %arg2[%c1] : memref<2xf32, #tpu.memory_space<smem>>
    %28 = arith.mulf %27, %27 : f32
    %cst_10 = arith.constant 1.000000e+00 : f32
    %29 = arith.addf %28, %cst_10 : f32
    %cst_11 = arith.constant 1.000000e+00 : f32
    %30 = arith.divf %cst_11, %29 : f32
    %cst_12 = arith.constant 1.000000e+00 : f32
    %31 = arith.addf %28, %cst_12 : f32
    %32 = math.rsqrt %31 : f32
    %33 = arith.mulf %27, %32 : f32
    %34 = vector.extract_strided_slice %12 {offsets = [1, 0], sizes = [1, 1024], strides = [1, 1]} : vector<2x1024xf32> to vector<1x1024xf32>
    %35 = vector.broadcast %30 : f32 to vector<1x1024xf32>
    %36 = arith.mulf %34, %35 : vector<1x1024xf32>
    %37 = vector.extract_strided_slice %10 {offsets = [1, 0], sizes = [1, 1024], strides = [1, 1]} : vector<2x1024xf32> to vector<1x1024xf32>
    %38 = vector.broadcast %33 : f32 to vector<1x1024xf32>
    %39 = arith.mulf %37, %38 : vector<1x1024xf32>
    %40 = arith.addf %36, %39 : vector<1x1024xf32>
    %41 = tpu.concatenate %26, %40 in 0 : vector<1x1024xf32>, vector<1x1024xf32> -> vector<2x1024xf32>
    %42 = arith.truncf %41 : vector<2x1024xf32> to vector<2x1024xbf16>
    %c0_13 = arith.constant 0 : index
    %c0_14 = arith.constant 0 : index
    %43 = vector.load %arg6[%c0_13, %c0_14] : memref<2x1024xbf16, #tpu.memory_space<vmem>>, vector<2x1024xbf16>
    tpu.vector_store %arg6[%c0_13, %c0_14], %42 {strides = array<i32>} : memref<2x1024xbf16, #tpu.memory_space<vmem>>, vector<2x1024xbf16>,
    return
  }
  func.func @transform_0(%arg0: i32, %arg1: memref<1xf32, #tpu.memory_space<smem>>, %arg2: memref<2xf32, #tpu.memory_space<smem>>) -> (i32, i32) {
    %c0_i32 = arith.constant 0 : i32
    %c0_i32_0 = arith.constant 0 : i32
    return %c0_i32, %arg0 : i32, i32
  }
  func.func @transform_1(%arg0: i32, %arg1: memref<1xf32, #tpu.memory_space<smem>>, %arg2: memref<2xf32, #tpu.memory_space<smem>>) -> (i32, i32) {
    %c0_i32 = arith.constant 0 : i32
    %c0_i32_0 = arith.constant 0 : i32
    %c0_i32_1 = arith.constant 0 : i32
    return %c0_i32, %c0_i32_0 : i32, i32
  }
  func.func @transform_2(%arg0: i32, %arg1: memref<1xf32, #tpu.memory_space<smem>>, %arg2: memref<2xf32, #tpu.memory_space<smem>>) -> (i32, i32) {
    %c0_i32 = arith.constant 0 : i32
    %c0_i32_0 = arith.constant 0 : i32
    return %c0_i32, %arg0 : i32, i32
  }
  func.func @transform_3(%arg0: i32, %arg1: memref<1xf32, #tpu.memory_space<smem>>, %arg2: memref<2xf32, #tpu.memory_space<smem>>) -> (i32, i32) {
    %c0_i32 = arith.constant 0 : i32
    %c0_i32_0 = arith.constant 0 : i32
    return %c0_i32, %arg0 : i32, i32
  }
}

</mosaic_0001>

<bundles_post_ra>
// kernel: tpu_custom_call.1
= control target key start
LH: loop header
LB: loop body
LE: loop exit
PB: predicated region body
PF: predicated region fallthrough
CT: control target
= control target key end

     0   :  { %s1113_s0 = inlined_call_operand.<no memory space> [shape: f32[1], index: 0, kind: input, shape index: {}]   ;;  %s1114_s1 = inlined_call_operand.vmem [shape: f32[2], index: 1, kind: input, shape index: {}]   ;;  %s1115_s2 = inlined_call_operand.hbm [shape: bf16[2,1024], index: 2, kind: input, shape index: {}]   ;;  %s1116_s3 = inlined_call_operand.vmem [shape: bf16[4,33], index: 3, kind: input, shape index: {}]   ;;  %s1117_s4 = inlined_call_operand.hbm [shape: bf16[33,1024], index: 4, kind: input, shape index: {}]   ;;  %s1118_s5 = inlined_call_operand.hbm [shape: bf16[2,1024], index: 5, kind: output, shape index: {}]  }
   0x1   :  { %s11_s20 = sshll.u32 %s1114_s1, 4  ;;  %s12_s20 = int_to_ptr.vmem [resolvable:$true] %s11_s20 }
   0x2   :  { %s845_s21 = scalar_lea.vmem %s12_s20, 16  ;;  %p850_p1 = scmp.lt.s32.totalorder %s12_s20, %s12_s20 }
   0x3   :  { %p846_p0 = scmp.ne.s32.totalorder %s12_s20, %s845_s21  ;;  %p851_p2 = scmp.lt.s32.totalorder %s845_s21, %s845_s21 }
   0x5   :  { %p852_p3 = por %p851_p2, %p850_p1 }
   0x7   :  { %p853_p4 = pnand %p852_p3, %p846_p0 }
   0x9   :  { %856 = shalt.err (!%p853_p4)  }
   0xa   :  { %s925_s22 = smov [#allocation4]  }
   0xb   :  { %14 = dma.vmem_to_smem %s12_s20, 16, %s925_s22, [#allocation2] }
   0xc   :  { %917 = dma.done.wait [#allocation2], 16 }
   0xd   :  { %918 = vsyncadd [#allocation2], 4294967280 }
   0xe   :  { %16 = sfence }
   0xf   :  { %17 = vsyncpa [#allocation6], 0 }
  0x10   :  { %18 = vsyncpa [#allocation9], 0 }
  0x11   :  { %19 = vsyncpa [#allocation7], 0  ;;  %s926_s23 = smov [#allocation5]   ;;  %s927_s25 = smov [#allocation8]  }
  0x12   :  { %s26_s24 = sshll.u32 %s926_s23, 4  ;;  %s37_s1 = sshll.u32 %s927_s25, 4  ;;  %s27_s24 = int_to_ptr.vmem [resolvable:$true] %s26_s24  ;;  %s38_s1 = int_to_ptr.vmem [resolvable:$true] %s37_s1 }
  0x13   :  { %s865_s26 = scalar_lea.vmem %s27_s24, 128  ;;  %p870_p6 = scmp.lt.s32.totalorder %s27_s24, %s27_s24 }
  0x14   :  { %p866_p5 = scmp.ne.s32.totalorder %s27_s24, %s865_s26  ;;  %p871_p7 = scmp.lt.s32.totalorder %s865_s26, %s865_s26 }
  0x16   :  { %p872_p8 = por %p871_p7, %p870_p6 }
  0x18   :  { %p873_p9 = pnand %p872_p8, %p866_p5 }
  0x1a   :  { %876 = shalt.err (!%p873_p9)
}
  0x1b   :  { %29 = dma.hbm_to_vmem [thread:$0]  %s1115_s2, 128, %s27_s24, [#allocation6]  }
  0x1c   :  { %s885_s29 = scalar_lea.vmem %s38_s1, 2560  ;;  %p890_p11 = scmp.lt.s32.totalorder %s38_s1, %s38_s1 }
  0x1d   :  { %p886_p10 = scmp.ne.s32.totalorder %s38_s1, %s885_s29  ;;  %p891_p12 = scmp.lt.s32.totalorder %s885_s29, %s885_s29 }
  0x1f   :  { %p892_p13 = por %p891_p12, %p890_p11 }
  0x21   :  { %p893_p0 = pnand %p892_p13, %p886_p10 }
  0x23   :  { %896 = shalt.err (!%p893_p0)
}
  0x24   :  { %s928_s30 = smov 512   ;;  %s929_s6 = smov 32  }
  0x25   :  { %43 = dma.hbm_to_vmem [thread:$0]  %s1117_s4, 2560, %s38_s1, [#allocation9], %s928_s30, %s928_s30, %s929_s6  }
  0x26   :  { %919 = dma.done.wait [#allocation6], 128  }
  0x27   :  { %920 = vsyncadd [#allocation6], 4294967168 }
  0x28   :  { %921 = dma.done.wait [#allocation9], 2560  }
  0x29   :  { %922 = vsyncadd [#allocation9], 4294964736  ;;  %v930_v0 = vmov 0   ;;  %s975_s2 = sld [smem:[#allocation4]]  ;;  %vm176_vm0 = vcmask 1040384   ;;  %v60_v4 = vld [vmem:[#allocation8 + $0x40] sm:$0xff] }
  0x2a   :  { %235 = vmatprep.mubr.bf16.mxu0 %v930_v0  ;;  %276 = vmatprep.mubr.bf16.mxu1 %v930_v0  ;;  %s977_s9 = sld [smem:[#allocation4 + $0x1]]  ;;  %v68_v1 = vld [vmem:[#allocation8 + $0x80] sm:$0x11]  ;;  %v981_v2 = vsel %vm176_vm0, 65535, %v930_v0  ;;  %v69_v3 = vld [vmem:[#allocation8 + $0x88] sm:$0x11] }
  0x2b   :  { %v780_v5 = vcombine.high %v68_v1, %v68_v1  ;;  %v782_v6 = vcombine.high %v69_v3, %v69_v3  ;;  %v779_v7 = vcombine.low %v68_v1, %v68_v1  ;;  %v781_v8 = vcombine.low %v69_v3, %v69_v3  ;;  %v64_v9 = vld [vmem:[#allocation8 + $0x60] sm:$0xff]  ;;  %v61_v10 = vld [vmem:[#allocation8 + $0x48] sm:$0xff]  ;;  %v70_v22 = vld [vmem:[#allocation8 + $0x90] sm:$0x11]  ;;  %s933_s21 = smov [#allocation10]  }
  0x2c   :  { %v65_v11 = vld [vmem:[#allocation8 + $0x68] sm:$0xff]  ;;  %v772_v12 = vcombine.high %v60_v4, %v64_v9  ;;  %v52_v18 = vld [vmem:[#allocation8] sm:$0xff]  ;;  %v71_v23 = vld [vmem:[#allocation8 + $0x98] sm:$0x11]  ;;  %v771_v25 = vcombine.low %v60_v4, %v64_v9  ;;  %v784_v29 = vcombine.high %v70_v22, %v70_v22  ;;  %v783_v34 = vcombine.low %v70_v22, %v70_v22  ;;  %s753_s22 = sshll.u32 %s933_s21, 4  ;;  %s754_s22 = int_to_ptr.vmem [resolvable:$true] %s753_s22 }
  0x2d   :  { %v774_v13 = vcombine.high %v61_v10, %v65_v11  ;;  %v183_v14 = vand.u32 %v780_v5, %v981_v2  ;;  %v189_v15 = vand.u32 %v782_v6, %v981_v2  ;;  %v180_v16 = vand.u32 %v779_v7, %v981_v2  ;;  %v56_v19 = vld [vmem:[#allocation8 + $0x20] sm:$0xff]  ;;  %v53_v20 = vld [vmem:[#allocation8 + $0x8] sm:$0xff]  ;;  %v62_v38 = vld [vmem:[#allocation8 + $0x50] sm:$0xff]  ;;  %s897_s23 = scalar_lea.vmem %s754_s22, 128  ;;  %p902_p2 = scmp.lt.s32.totalorder %s754_s22, %s754_s22 }
  0x2e   :  { %v186_v17 = vand.u32 %v781_v8, %v981_v2  ;;  %v57_v21 = vld [vmem:[#allocation8 + $0x28] sm:$0xff]  ;;  %v773_v26 = vcombine.low %v61_v10, %v65_v11  ;;  %v764_v27 = vcombine.high %v52_v18, %v56_v19  ;;  %v786_v30 = vcombine.high %v71_v23, %v71_v23  ;;  %v66_v39 = vld [vmem:[#allocation8 + $0x70] sm:$0xff]  ;;  %v63_v40 = vld [vmem:[#allocation8 + $0x58] sm:$0xff]  ;;  %p898_p1 = scmp.ne.s32.totalorder %s754_s22, %s897_s23  ;;  %p903_p3 = scmp.lt.s32.totalorder %s897_s23, %s897_s23 }
  0x2f   :  { %s453_s4 = smul.f32 %s975_s2, %s975_s2  ;;  %213 = vmatprep.subr.bf16.mxu0 %v183_v14  ;;  %254 = vmatprep.subr.bf16.mxu1 %v189_v15  ;;  %v766_v28 = vcombine.high %v53_v20, %v57_v21  ;;  %v763_v31 = vcombine.low %v52_v18, %v56_v19  ;;  %v765_v33 = vcombine.low %v53_v20, %v57_v21  ;;  %v67_v41 = vld [vmem:[#allocation8 + $0x78] sm:$0xff]  ;;  %vm172_vm1 = vcmask 269312   ;;  %v54_v47 = vld [vmem:[#allocation8 + $0x10] sm:$0xff] }
  0x30   :  { %s521_s10 = smul.f32 %s977_s9, %s977_s9  ;;  %214 = vmatpush1.bf16.msra.mxu0 %v180_v16  ;;  %255 = vmatpush1.bf16.msra.mxu1 %v186_v17  ;;  %v785_v35 = vcombine.low %v71_v23, %v71_v23  ;;  %v195_v36 = vand.u32 %v784_v29, %v981_v2  ;;  %v201_v37 = vand.u32 %v786_v30, %v981_v2  ;;  %v51_v42 = vld [vmem:[%s1116_s3] sm:$0x3]  ;;  %v58_v48 = vld [vmem:[#allocation8 + $0x30] sm:$0xff]  ;;  %v487_v15 = vlaneseq  ;;  %p904_p4 = por %p903_p3, %p902_p2 }
  0x31   :  { %s454_s11 = sadd.f32 1.0, %s453_s4  ;;  %215 = vmatprep.subr.bf16.mxu0 %v772_v12  ;;  %256 = vmatprep.subr.bf16.mxu1 %v774_v13  ;;  %v192_v43 = vand.u32 %v783_v34, %v981_v2  ;;  %v776_v45 = vcombine.high %v62_v38, %v66_v39  ;;  %v778_v46 = vcombine.high %v63_v40, %v67_v41  ;;  %v55_v49 = vld [vmem:[#allocation8 + $0x18] sm:$0xff]  ;;  %v931_v13 = vmov 1983009808  }
  0x32   :  { %s522_s12 = sadd.f32 1.0, %s521_s10  ;;  %v198_v44 = vand.u32 %v785_v35, %v981_v2  ;;  %v59_v50 = vld [vmem:[#allocation8 + $0x38] sm:$0xff]  ;;  %v775_v51 = vcombine.low %v62_v38, %v66_v39  ;;  %v777_v52 = vcombine.low %v63_v40, %v67_v41  ;;  %v768_v54 = vcombine.high %v54_v47, %v58_v48  ;;  %p905_p5 = pnand %p904_p4, %p898_p1 }
  0x33   :  { %v455_v24 = vstv %s454_s11  ;;  %v770_v55 = vcombine.high %v55_v49, %v59_v50  ;;  %v767_v57 = vcombine.low %v54_v47, %v58_v48  ;;  %v769_v58 = vcombine.low %v55_v49, %v59_v50  ;;  %v1010_v11 = vld [vmem:[#allocation5] sm:$0xff] }
  0x34   :  { %821 = vrcp.f32 %v455_v24  ;;  %v523_v32 = vstv %s522_s12  ;;  %216 = vmatpush1.bf16.msra.mxu0 %v771_v25  ;;  %257 = vmatpush1.bf16.msra.mxu1 %v773_v26  ;;  %v485_v14 = vunpack.c.l.s4 %v931_v13  ;;  %v1015_v20 = vstv %s1113_s0 }
  0x35   :  { %823 = vrsqrt.f32 %v455_v24  ;;  %217 = vmatprep.subr.bf16.mxu0 %v764_v27  ;;  %258 = vmatprep.subr.bf16.mxu1 %v766_v28  ;;  %v450_v26 = vunpack.c.l.bf16 %v1010_v11 }
  0x36   :  { %825 = vrcp.f32 %v523_v32 }
  0x37   :  { %827 = vrsqrt.f32 %v523_v32  ;;  %v486_v32 = vunpack.c.0.s8 %v485_v14 }
  0x38   :  { %218 = vmatpush1.bf16.msra.mxu0 %v763_v31  ;;  %259 = vmatpush1.bf16.msra.mxu1 %v765_v33  ;;  %v1022_v33 = vshrl.u32 %v487_v15, 7 }
  0x39   :  { %295 = vmatprep.subr.bf16.mxu0 %v195_v36  ;;  %336 = vmatprep.subr.bf16.mxu1 %v201_v37 }
  0x3a   :  { %v592_v50 = vsub.s32 0, %v1022_v33 }
  0x3b   :  { %787 = vmatmul.mubr.msk.bf16.vlgmr.msra.gmra.mxu0 %vm172_vm1, %v51_v42  ;;  %788 = vmatmul.mubr.msk.bf16.vlgmr.msra.gmra.mxu1 %vm172_vm1, %v51_v42 }
  0x3c   :  { %296 = vmatpush1.bf16.msra.mxu0 %v192_v43  ;;  %337 = vmatpush1.bf16.msra.mxu1 %v198_v44 }
  0x3d   :  { %297 = vmatprep.subr.bf16.mxu0 %v776_v45  ;;  %338 = vmatprep.subr.bf16.mxu1 %v778_v46  ;;  %v1034_v45 = vsub.s32 %v486_v32, %v1022_v33 }
  0x3e   :  { %317 = vmatprep.mubr.bf16.mxu0 %v930_v0  ;;  %358 = vmatprep.mubr.bf16.mxu1 %v930_v0 }
  0x40   :  { %298 = vmatpush1.bf16.msra.mxu0 %v775_v51  ;;  %339 = vmatpush1.bf16.msra.mxu1 %v777_v52  ;;  %v596_v52 = vsub.s32 2, %v1022_v33 }
  0x41   :  { %v822_v53 = vpop.eup %821  ;;  %299 = vmatprep.subr.bf16.mxu0 %v768_v54  ;;  %340 = vmatprep.subr.bf16.mxu1 %v770_v55  ;;  %v604_v54 = vsub.s32 6, %v1022_v33 }
  0x42   :  { %v824_v56 = vpop.eup %823  ;;  %796 = vpush %v822_v53  ;;  %v600_v53 = vsub.s32 4, %v1022_v33 }
  0x43   :  { %798 = vpush %v824_v56  ;;  %v826_v59 = vpop.eup %825 }
  0x44   :  { %v828_v60 = vpop.eup %827  ;;  %800 = vpush %v826_v59  ;;  %300 = vmatpush1.bf16.msra.mxu0 %v767_v57  ;;  %341 = vmatpush1.bf16.msra.mxu1 %v769_v58  ;;  %v634_v59 = vsub.s32 1, %v1022_v33 }
  0x45   :  { %802 = vpush %v828_v60 }
  0x47   :  { %789 = vmatmul.mubr.msk.bf16.vlgmr.msra.gmra.mxu0 %vm172_vm1, %v51_v42  ;;  %790 = vmatmul.mubr.msk.bf16.vlgmr.msra.gmra.mxu1 %vm172_vm1, %v51_v42 }
  0x73   :  { %s1004_s3 = spop %796 }
  0x74   :  { %s1006_s15 = spop %798  ;;  %v462_v27 = vstv %s1004_s3 }
  0x75   :  { %s1008_s16 = spop %800  ;;  %s461_s20 = smul.f32 %s1006_s15, %s975_s2  ;;  %v463_v39 = vmul.f32 %v462_v27, %v450_v26 }
  0x76   :  { %s803_s19 = spop %802  ;;  %v530_v38 = vstv %s1008_s16 }
  0x77   :  { %s529_s0 = smul.f32 %s803_s19, %s977_s9  ;;  %v1031_v42 = vstv %s461_s20  ;;  %v531_v49 = vmul.f32 %v530_v38, %v450_v26 }
  0x79   :  { %v1036_v46 = vstv %s529_s0 }
  0xfb   :  { %v237_v61 = vpop.f32.mrf.mxu0  ;;  %v278_v62 = vpop.f32.mrf.mxu1 }
  0xfc   :  { %829 = vtanh.f32 %v237_v61 }
  0xfd   :  { %831 = vtanh.f32 %v278_v62  ;;  %v239_v63 = vpop.f32.mrf.mxu0  ;;  %v280_v0 = vpop.f32.mrf.mxu1 }
  0xfe   :  { %833 = vtanh.f32 %v239_v63 }
  0xff   :  { %835 = vtanh.f32 %v280_v0  ;;  %v241_v1 = vpop.f32.mrf.mxu0  ;;  %v282_v2 = vpop.f32.mrf.mxu1 }
 0x101   :  { %v242_v3 = vpop.f32.mrf.mxu0  ;;  %v283_v4 = vpop.f32.mrf.mxu1 }
 0x107   :  { %v319_v5 = vpop.f32.mrf.mxu0  ;;  %v360_v6 = vpop.f32.mrf.mxu1 }
 0x108   :  { %837 = vtanh.f32 %v319_v5 }
 0x109   :  { %v830_v7 = vpop.eup %829  ;;  %839 = vtanh.f32 %v360_v6  ;;  %v321_v8 = vpop.f32.mrf.mxu0 }
 0x10a   :  { %v362_v9 = vpop.f32.mrf.mxu1  ;;  %v832_v10 = vpop.eup %831  ;;  %841 = vtanh.f32 %v321_v8  ;;  %v384_v12 = vrot.slane %v830_v7, 6 }
 0x10b   :  { %v834_v16 = vpop.eup %833  ;;  %843 = vtanh.f32 %v362_v9  ;;  %v323_v17 = vpop.f32.mrf.mxu0  ;;  %v386_v19 = vrot.slane %v832_v10, 6 }
 0x10c   :  { %v364_v18 = vpop.f32.mrf.mxu1  ;;  %v836_v21 = vpop.eup %835  ;;  %v385_v22 = vrot.slane %v834_v16, 6  ;;  %v400_v23 = vsub.f32 %v830_v7, %v384_v12 }
 0x10d   :  { %v324_v24 = vpop.f32.mrf.mxu0  ;;  %v387_v28 = vrot.slane %v836_v21, 6  ;;  %v402_v29 = vsub.f32 %v832_v10, %v386_v19 }
 0x10e   :  { %v365_v25 = vpop.f32.mrf.mxu1  ;;  %v401_v30 = vsub.f32 %v834_v16, %v385_v22  ;;  %v409_v31 = vmul.f32 %v1015_v20, %v400_v23 }
 0x10f   :  { %v403_v34 = vsub.f32 %v836_v21, %v387_v28  ;;  %v411_v35 = vmul.f32 %v1015_v20, %v402_v29  ;;  %v638_v28 = vsub.s32 3, %v1022_v33 }
 0x110   :  { %v410_v36 = vmul.f32 %v1015_v20, %v401_v30  ;;  %v425_v37 = vrot.slane %v409_v31, 2 }
 0x111   :  { %v412_v40 = vmul.f32 %v1015_v20, %v403_v34  ;;  %v427_v41 = vrot.slane %v411_v35, 2 }
 0x112   :  { %v426_v43 = vrot.slane %v410_v36, 2  ;;  %v441_v44 = vadd.f32 %v830_v7, %v425_v37  ;;  %v642_v36 = vsub.s32 5, %v1022_v33  ;;  %v646_v37 = vsub.s32 7, %v1022_v33 }
 0x113   :  { %v428_v47 = vrot.slane %v412_v40, 2  ;;  %v443_v48 = vadd.f32 %v832_v10, %v427_v41 }
 0x114   :  { %v442_v51 = vadd.f32 %v834_v16, %v426_v43  ;;  %v466_v57 = vmul.f32 %v1031_v42, %v441_v44  ;;  %v534_v58 = vmul.f32 %v1036_v46, %v441_v44 }
 0x115   :  { %v838_v55 = vpop.eup %837  ;;  %v444_v56 = vadd.f32 %v836_v21, %v428_v47  ;;  %v468_v63 = vmul.f32 %v1031_v42, %v443_v48  ;;  %v536_v4 = vmul.f32 %v1036_v46, %v443_v48 }
 0x116   :  { %v840_v60 = vpop.eup %839  ;;  %v388_v61 = vrot.slane %v838_v55, 6  ;;  %v467_v62 = vmul.f32 %v1031_v42, %v442_v51  ;;  %v535_v0 = vmul.f32 %v1036_v46, %v442_v51 }
 0x117   :  { %v842_v1 = vpop.eup %841  ;;  %v390_v2 = vrot.slane %v840_v60, 6  ;;  %v469_v3 = vmul.f32 %v1031_v42, %v444_v56  ;;  %v537_v5 = vmul.f32 %v1036_v46, %v444_v56  ;;  %v932_v56 = vmov 1966171168  }
 0x118   :  { %v844_v6 = vpop.eup %843  ;;  %v389_v7 = vrot.slane %v842_v1, 6  ;;  %v404_v8 = vsub.f32 %v838_v55, %v388_v61  ;;  %v482_v9 = vcombine.low %v466_v57, %v467_v62  ;;  %v550_v10 = vcombine.low %v534_v58, %v535_v0 }
 0x119   :  { %v391_v12 = vrot.slane %v844_v6, 6  ;;  %v406_v13 = vsub.f32 %v840_v60, %v390_v2  ;;  %v483_v14 = vcombine.low %v468_v63, %v469_v3  ;;  %v551_v15 = vcombine.low %v536_v4, %v537_v5 }
 0x11a   :  { %v405_v16 = vsub.f32 %v842_v1, %v389_v7  ;;  %v413_v17 = vmul.f32 %v1015_v20, %v404_v8  ;;  %v490_v18 = vrot.slane %v482_v9, %v1034_v45  ;;  %v558_v19 = vrot.slane %v550_v10, %v1034_v45 }
 0x11b   :  { %v407_v21 = vsub.f32 %v844_v6, %v391_v12  ;;  %v415_v22 = vmul.f32 %v1015_v20, %v406_v13  ;;  %v497_v23 = vrot.slane %v483_v14, %v1034_v45  ;;  %v565_v24 = vrot.slane %v551_v15, %v1034_v45 }
 0x11c   :  { %v414_v25 = vmul.f32 %v1015_v20, %v405_v16  ;;  %v429_v26 = vrot.slane %v413_v17, 2  ;;  %v451_v7 = vunpack.c.h.bf16 %v1010_v11 }
 0x11d   :  { %v416_v29 = vmul.f32 %v1015_v20, %v407_v21  ;;  %v431_v30 = vrot.slane %v415_v22, 2  ;;  %v498_v31 = vcombine.low %v490_v18, %v497_v23  ;;  %v566_v32 = vcombine.low %v558_v19, %v565_v24 }
 0x11e   :  { %v430_v34 = vrot.slane %v414_v25, 2  ;;  %v445_v35 = vadd.f32 %v838_v55, %v429_v26  ;;  %v701_v20 = vunpack.c.l.s4 %v932_v56  ;;  %v464_v18 = vmul.f32 %v462_v27, %v451_v7 }
 0x11f   :  { %v432_v40 = vrot.slane %v416_v29, 2  ;;  %v447_v41 = vadd.f32 %v840_v60, %v431_v30  ;;  %v518_v43 = vadd.f32 %v498_v31, %v463_v39  ;;  %v586_v44 = vadd.f32 %v566_v32, %v531_v49 }
 0x120   :  { %v446_v47 = vadd.f32 %v842_v1, %v430_v34  ;;  %v470_v48 = vmul.f32 %v1031_v42, %v445_v35  ;;  %v538_v51 = vmul.f32 %v1036_v46, %v445_v35  ;;  %v702_v12 = vunpack.c.0.s8 %v701_v20 }
 0x121   :  { %v448_v57 = vadd.f32 %v844_v6, %v432_v40  ;;  %v472_v58 = vmul.f32 %v1031_v42, %v447_v41  ;;  %v540_v55 = vmul.f32 %v1036_v46, %v447_v41  ;;  %v593_v61 = vrot.slane %v518_v43, %v592_v50 }
 0x122   :  { %v471_v62 = vmul.f32 %v1031_v42, %v446_v47  ;;  %v539_v39 = vmul.f32 %v1036_v46, %v446_v47  ;;  %v597_v49 = vrot.slane %v518_v43, %v596_v52  ;;  %v601_v60 = vrot.slane %v518_v43, %v600_v53 }
 0x123   :  { %v473_v63 = vmul.f32 %v1031_v42, %v448_v57  ;;  %v541_v0 = vmul.f32 %v1036_v46, %v448_v57  ;;  %v605_v1 = vrot.slane %v518_v43, %v604_v54  ;;  %v635_v2 = vrot.slane %v586_v44, %v634_v59 }
 0x124   :  { %v499_v3 = vcombine.low %v470_v48, %v471_v62  ;;  %v567_v4 = vcombine.low %v538_v51, %v539_v39  ;;  %v639_v5 = vrot.slane %v586_v44, %v638_v28  ;;  %v643_v6 = vrot.slane %v586_v44, %v642_v36 }
 0x125   :  { %v500_v8 = vcombine.low %v472_v58, %v473_v63  ;;  %v568_v9 = vcombine.low %v540_v55, %v541_v0  ;;  %v647_v10 = vrot.slane %v586_v44, %v646_v37  ;;  %v672_v15 = vsel %vm176_vm0, %v593_v61, %v635_v2 }
 0x126   :  { %v507_v42 = vrot.slane %v499_v3, %v1034_v45  ;;  %v575_v46 = vrot.slane %v567_v4, %v1034_v45  ;;  %v673_v16 = vsel %vm176_vm0, %v597_v49, %v639_v5  ;;  %v674_v17 = vsel %vm176_vm0, %v601_v60, %v643_v6 }
 0x127   :  { %v514_v13 = vrot.slane %v500_v8, %v1034_v45  ;;  %v582_v14 = vrot.slane %v568_v9, %v1034_v45  ;;  %v675_v11 = vsel %vm176_vm0, %v605_v1, %v647_v10  ;;  %v532_v21 = vmul.f32 %v530_v38, %v451_v7 }
 0x128   :  { %v705_v23 = vsub.s32 %v702_v12, %v1022_v33  ;;  %v792_v26 = vpack.c.bf16 %v673_v16, %v672_v15  ;;  %v793_v45 = vpack.c.bf16 %v675_v11, %v674_v17 }
 0x129   :  { %v515_v19 = vcombine.low %v507_v42, %v514_v13  ;;  %v583_v22 = vcombine.low %v575_v46, %v582_v14 }
 0x12a   :  { %v706_v40 = vrot.slane %v792_v26, %v705_v23  ;;  %v713_v41 = vrot.slane %v793_v45, %v705_v23 }
 0x12b   :  { %v519_v24 = vadd.f32 %v515_v19, %v464_v18  ;;  %v587_v25 = vadd.f32 %v583_v22, %v532_v21 }
 0x12c   :  { %v728_v51 = vcombine.low %v706_v40, %v713_v41 }
 0x12d   :  { %v609_v29 = vrot.slane %v519_v24, %v592_v50  ;;  %v613_v30 = vrot.slane %v519_v24, %v596_v52  ;;  %v617_v31 = vrot.slane %v519_v24, %v600_v53  ;;  %v621_v27 = vrot.slane %v519_v24, %v604_v54 }
 0x12e   :  { %v651_v38 = vrot.slane %v587_v25, %v634_v59  ;;  %v655_v32 = vrot.slane %v587_v25, %v638_v28  ;;  %v659_v34 = vrot.slane %v587_v25, %v642_v36  ;;  %v663_v35 = vrot.slane %v587_v25, %v646_v37 }
 0x12f   :  { %v736_v59 = vrot.slane %v728_v51, %v705_v23 }
 0x130   :  { %v676_v43 = vsel %vm176_vm0, %v609_v29, %v651_v38  ;;  %v677_v50 = vsel %vm176_vm0, %v613_v30, %v655_v32  ;;  %v678_v52 = vsel %vm176_vm0, %v617_v31, %v659_v34  ;;  %v679_v44 = vsel %vm176_vm0, %v621_v27, %v663_v35 }
 0x131   :  { %v794_v53 = vpack.c.bf16 %v677_v50, %v676_v43  ;;  %v795_v47 = vpack.c.bf16 %v679_v44, %v678_v52 }
 0x133   :  { %v720_v48 = vrot.slane %v794_v53, %v705_v23  ;;  %v727_v54 = vrot.slane %v795_v47, %v705_v23 }
 0x135   :  { %v729_v33 = vcombine.low %v720_v48, %v727_v54 }
 0x137   :  { %v743_v28 = vrot.slane %v729_v33, %v705_v23 }
 0x139   :  { %v744_v36 = vcombine.low %v736_v59, %v743_v28 }
 0x13b   :  { %746 = vst [vmem:[#allocation10] sm:$0xff] %v744_v36 }
 0x13c   :  { %908 = shalt.err (!%p905_p5)
}
 0x13d   :  { %756 = dma.vmem_to_hbm [thread:$0]  %s754_s22, 128, %s1118_s5, [#allocation7]  }
 0x13e   :  { %923 = dma.done.wait [#allocation7], 128  }
 0x13f   :  { %924 = vsyncadd [#allocation7], 4294967168 }
 0x140   :  { %760 = vsyncpa [#allocation6], 1 }
 0x141   :  { %761 = vsyncpa [#allocation9], 1 }
 0x142   :  { %762 = vsyncpa [#allocation7], 1 }

</bundles_post_ra>
